<compile_context>
chip_gen: v7x
topology: tpu7x:2x2x1
jax: 0.10.0
libtpu: 0.0.40
codegen_flags: <defaults>
</compile_context>

<pallas_src>
import jax
import jax.numpy as jnp
from jax.experimental import pallas as pl
from jax.experimental.pallas import tpu as pltpu


def _exp_kernel(x_ref, o_ref):
    # Elementwise exp on the whole VMEM tile (transcendental -> EUP slot).
    o_ref[...] = jnp.exp(x_ref[...])


def _sublane_multiple(dtype) -> int:
    # Sublane packing minimums: f32 -> 8, bf16/f16 -> 16, int8/fp8 -> 32.
    itemsize = jnp.dtype(dtype).itemsize
    return {4: 8, 2: 16, 1: 32}.get(itemsize, 8)


def exponential(x: jax.Array, *,
                target_block_bytes: int = 4 * 1024 * 1024,
                min_grid: int = 4) -> jax.Array:
    """Elementwise exp via a Pallas TPU kernel. Matches torch.exp(x) semantics."""
    orig_shape = x.shape

    # torch.exp promotes integer / bool inputs to floating point; mirror that.
    if not jnp.issubdtype(x.dtype, jnp.floating):
        x = x.astype(jnp.float32)
    dtype = x.dtype
    itemsize = jnp.dtype(dtype).itemsize
    sublane = _sublane_multiple(dtype)
    total = x.size

    # Widest lane count (big contiguous DMAs, unmasked vst) that divides total.
    lanes = 0
    for cand in (1024, 512, 256, 128):
        if total >= cand and total % cand == 0:
            lanes = cand
            break
    rows = total // lanes if lanes else 0

    # Fall back to plain XLA exp when:
    #  - input is empty or tiny (kernel-launch overhead dominates),
    #  - total isn't a multiple of 128 (a pad+slice path would add two extra
    #    full HBM passes; fused XLA elementwise already hits roofline),
    #  - there are fewer rows than one sublane tile.
    if lanes == 0 or rows < sublane or total < 2 * sublane * 1024:
        return jnp.reshape(jnp.exp(x), orig_shape)

    # Row tile sized for ~target_block_bytes per block, a multiple of the
    # dtype's sublane packing.
    tr = max(sublane, (target_block_bytes // (lanes * itemsize)) // sublane * sublane)
    # Keep >= min_grid blocks when the input is big enough so the single
    # "parallel" grid axis shards usefully across v7x's two TensorCores.
    if rows >= min_grid * sublane:
        tr = min(tr, max(sublane, (rows // min_grid) // sublane * sublane))
    # Never make a tile larger than the (sublane-rounded) row count.
    tr = min(tr, pl.cdiv(rows, sublane) * sublane)

    # Ragged final block is allowed: out-of-bounds reads feed only discarded
    # lanes and out-of-bounds writes are masked — no pad, no post-slice.
    grid = pl.cdiv(rows, tr)

    x2d = jnp.reshape(x, (rows, lanes))  # free metadata op, no extra HBM pass

    out2d = pl.pallas_call(
        _exp_kernel,
        out_shape=jax.ShapeDtypeStruct((rows, lanes), dtype),
        grid_spec=pltpu.PrefetchScalarGridSpec(
            num_scalar_prefetch=0,
            grid=(grid,),
            in_specs=[pl.BlockSpec((tr, lanes), lambda i: (i, 0))],
            out_specs=pl.BlockSpec((tr, lanes), lambda i: (i, 0)),
        ),
        compiler_params=pltpu.CompilerParams(
            # Single independent axis: shards across the 2 TensorCores on v7x,
            # near-neutral on v5e/v6e.
            dimension_semantics=("parallel",),
            # 4 MiB blocks double-buffered in+out = 16 MiB, which exactly hits
            # v5e's scoped-VMEM default; raise explicitly (still << 64 MiB v7x).
            vmem_limit_bytes=32 * 1024 * 1024,
        ),
        cost_estimate=pl.CostEstimate(
            flops=0,
            transcendentals=total,
            bytes_accessed=2 * total * itemsize,
        ),
    )(x2d)

    return jnp.reshape(out2d, orig_shape)


if __name__ == "__main__":
    key = jax.random.PRNGKey(0)

    # Small NCHW input consistent with a generic forward: batch=2, ch=4, 16x16.
    # (Small enough that the wrapper takes the fast jnp.exp fallback path.)
    x_small = jax.random.normal(key, (2, 4, 16, 16), dtype=jnp.float32)
    y_small = jax.block_until_ready(exponential(x_small))
    assert y_small.shape == x_small.shape and y_small.dtype == x_small.dtype
    assert jnp.allclose(y_small, jnp.exp(x_small), rtol=1e-6, atol=1e-6)

    # Mid-sized input that exercises the Pallas kernel path (lanes=1024,
    # grid=4 so both v7x TensorCores get work).
    x_mid = jax.random.normal(jax.random.PRNGKey(1), (2, 4, 64, 128), dtype=jnp.float32)
    y_mid = jax.block_until_ready(exponential(x_mid))
    assert jnp.allclose(y_mid, jnp.exp(x_mid), rtol=1e-6, atol=1e-6)

    # Ragged-row case: 136 rows of 1024 lanes -> partial final block, handled
    # by Pallas masked writes (no pad / slice).
    x_ragged = jax.random.normal(jax.random.PRNGKey(2), (1, 1, 136, 1024), dtype=jnp.float32)
    y_ragged = jax.block_until_ready(exponential(x_ragged))
    assert jnp.allclose(y_ragged, jnp.exp(x_ragged), rtol=1e-6, atol=1e-6)

    # Non-128-multiple size -> clean fallback, no padding copies.
    x_odd = jax.random.normal(jax.random.PRNGKey(3), (3, 7, 129, 65), dtype=jnp.float32)
    y_odd = jax.block_until_ready(exponential(x_odd))
    assert jnp.allclose(y_odd, jnp.exp(x_odd), rtol=1e-6, atol=1e-6)

    # Integer input promotes to float32 (torch.exp semantics).
    x_int = jnp.arange(2 * 4 * 16 * 16, dtype=jnp.int32).reshape(2, 4, 16, 16) % 5
    y_int = jax.block_until_ready(exponential(x_int))
    assert y_int.dtype == jnp.float32
    assert jnp.allclose(y_int, jnp.exp(x_int.astype(jnp.float32)), rtol=1e-6, atol=1e-6)

    print("KERNEL_OK")
</pallas_src>

<mosaic_0001>
module attributes {stable_mosaic.version = 11 : i64} {
  func.func @_exp_kernel(%arg0: i32, %arg1: memref<16x1024xf32, #tpu.memory_space<vmem>>, %arg2: memref<16x1024xf32, #tpu.memory_space<vmem>>) attributes {dimension_semantics = [#tpu.dimension_semantics<parallel>], iteration_bounds = array<i64: 4>, scalar_prefetch = 0 : i64, scratch_operands = 0 : i64, tpu.core_type = #tpu.core_type<tc>, window_params = [{transform_indices = @transform_0, window_bounds = array<i64: 16, 1024>}, {transform_indices = @transform_1, window_bounds = array<i64: 16, 1024>}]} {
    %c0 = arith.constant 0 : index
    %c0_0 = arith.constant 0 : index
    %0 = vector.load %arg1[%c0, %c0_0] : memref<16x1024xf32, #tpu.memory_space<vmem>>, vector<16x1024xf32>
    %1 = math.exp %0 : vector<16x1024xf32>
    %c0_1 = arith.constant 0 : index
    %c0_2 = arith.constant 0 : index
    %2 = vector.load %arg2[%c0_1, %c0_2] : memref<16x1024xf32, #tpu.memory_space<vmem>>, vector<16x1024xf32>
    tpu.vector_store %arg2[%c0_1, %c0_2], %1 {strides = array<i32>} : memref<16x1024xf32, #tpu.memory_space<vmem>>, vector<16x1024xf32>,
    return
  }
  func.func @transform_0(%arg0: i32) -> (i32, i32) {
    %c0_i32 = arith.constant 0 : i32
    %c0_i32_0 = arith.constant 0 : i32
    return %arg0, %c0_i32 : i32, i32
  }
  func.func @transform_1(%arg0: i32) -> (i32, i32) {
    %c0_i32 = arith.constant 0 : i32
    %c0_i32_0 = arith.constant 0 : i32
    return %arg0, %c0_i32 : i32, i32
  }
}

</mosaic_0001>

<bundles_post_ra>
// kernel: tpu_custom_call.1
= control target key start
LH: loop header
LB: loop body
LE: loop exit
PB: predicated region body
PF: predicated region fallthrough
CT: control target
= control target key end

     0   :  { %6 = vsyncpa [#allocation3], 0  ;;  %s707_s0 = inlined_call_operand.hbm [shape: f32[64,1024], index: 0, kind: input, shape index: {}]   ;;  %s708_s1 = inlined_call_operand.hbm [shape: f32[64,1024], index: 1, kind: output, shape index: {}]  }
   0x1   :  { %8 = vsyncpa [#allocation3 + $0x1], 0 }
   0x2   :  { %9 = vsyncpa [#allocation4], 0 }
   0x3   :  { %11 = vsyncpa [#allocation4 + $0x1], 0  ;;  %s506_s6 = smov 0   ;;  %s508_s7 = smov 0  }
   0x4   :  { %s510_s8 = smov 0   ;;  %s512_s9 = smov 0  }
   0x5 LB: > { %s527_s10 = sadd.s32 4294967295, %s488_s9   ;;  %s290_s11 = sadd.s32 4294967294, %s488_s9   ;;  %s488_s9 = sphi %s512_s9, %s720_s9   ;;  %s484_s8 = sphi %s510_s8, %s719_s8   ;;  %s480_s7 = sphi %s508_s7, %s718_s7   ;;  %s476_s6 = sphi %s506_s6, %s717_s6  }
   0x6   : > { %s531_s12 = sadd.s32 1, %s488_s9   ;;  %s24_s13 = sadd.s32 1, %s484_s8 }
   0x7   : > { %s21_s14 = ssub.s32 %s488_s9, %s531_s12  ;;  %p31_p0 = scmp.ne.s32.totalorder %s484_s8, %s480_s7 }
   0x8   : > { %p22_p1 = scmp.eq.s32.totalorder %s21_s14, 0  ;;  %p32_p2 = scmp.eq.s32.totalorder %s488_s9, 0 }
   0x9   : > { %p37_p3 = scmp.ne.s32.totalorder %s480_s7, %s476_s6  ;;  %p38_p4 = scmp.eq.s32.totalorder %s527_s10, 0 }
   0xa   : > { %s543_s15 = scalar_select %p22_p1, %s484_s8, %s24_s13  }
   0xb   : > { %p545_p5 = por %p32_p2, %p31_p0  ;;  %p549_p6 = por %p38_p4, %p37_p3 }
   0xc   : > { %p61_p7 = scmp.eq.s32.totalorder %s527_s10, 3  ;;  %p67_p8 = scmp.eq.s32.totalorder %s290_s11, 3 }
   0xd   : > { %p322_p9 = scmp.lt.s32.totalorder %s488_s9, 4  ;;  %s87_s20 = sand.u32 1, %s484_s8  }
   0xe   : > { %p555_p10 = por %p61_p7, %p31_p0  ;;  %p559_p11 = por %p67_p8, %p37_p3 }
   0xf   : > { %s307_s21 = sshll.u32 %s488_s9, 11  ;;  %s293_s22 = sshll.u32 %s87_s20, 7 }
  0x10   : > { %s712_s18 = scalar_select %p555_p10, 1, 0 }
  0x11   : > { %s713_s19 = scalar_select %p559_p11, 1, 0 }
  0x12   : > { %s568_s25 = scalar_lea.hbm %s707_s0, %s307_s21  ;;  %s91_s26 = scalar_lea.vmem [#allocation2], %s293_s22 }
  0x13   : > { %s99_s27 = sshll.u32 %s91_s26, 4  ;;  %p572_p12 = pnand %p322_p9, %p545_p5  ;;  %s576_s27 = int_to_ptr.vmem [resolvable:$true] %s99_s27 }
  0x14   : > { %s578_s29 = scalar_lea.sflag [#allocation3], %s87_s20  ;;  %s392_s30 = scalar_lea.hbm %s568_s25, 2048 }
  0x15   : > { %p393_p13 = scmp.ne.s32.totalorder %s568_s25, %s392_s30  ;;  %p394_p0 = pneg %p572_p12 }
  0x16   : > { %s397_s4 = scalar_lea.hbm %s707_s0, 8192  ;;  %p398_p3 = scmp.lt.u32.totalorder %s568_s25, %s707_s0 }
  0x17   : > { %p395_p1 = pnand %p394_p0, %p393_p13  ;;  %p399_p4 = scmp.lt.u32.totalorder %s397_s4, %s392_s30 }
  0x18   : > { %p401_p7 = scmp.lt.u32.totalorder %s392_s30, %s568_s25 }
  0x19   : > { %p396_p2 = pneg %p395_p1  ;;  %p400_p5 = por %p399_p4, %p398_p3 }
  0x1b   : > { %p402_p8 = por %p401_p7, %p400_p5 }
  0x1d   : > { %p403_p9 = pnand %p402_p8, %p396_p2 }
  0x1f   : > { %406 = shalt.err (!%p403_p9)
}
  0x20   : > { %s407_s13 = scalar_lea.vmem %s576_s27, 2048  ;;  %s490_s14 = smov [#allocation2]  }
  0x21   : > { %p408_p13 = scmp.ne.s32.totalorder %s576_s27, %s407_s13  ;;  %s412_s16 = sshll.u32 %s490_s14, 4  ;;  %s413_s16 = int_to_ptr.vmem [resolvable:$false] %s412_s16 }
  0x22   : > { %s414_s20 = scalar_lea.vmem %s413_s16, 4096  ;;  %p415_p10 = scmp.lt.s32.totalorder %s576_s27, %s413_s16 }
  0x23   : > { %p410_p1 = pnand %p408_p13, %p394_p0  ;;  %p416_p3 = scmp.lt.s32.totalorder %s414_s20, %s407_s13 }
  0x25   : > { %p411_p11 = pneg %p410_p1  ;;  %p417_p4 = por %p416_p3, %p415_p10 }
  0x27   : > { %p418_p5 = pnand %p417_p4, %p411_p11 }
  0x29   : > { %421 = shalt.err (!%p418_p5)
}
  0x2a   : > { %s491_s21 = smov 1024   ;;  %s492_s22 = smov 64  }
  0x2b   : > { %317 = dma.hbm_to_vmem [thread:$0]  (!%p572_p12), %s568_s25, 2048, %s576_s27, %s578_s29, %s491_s21, %s491_s21, %s492_s22  }
  0x2c   : > { %p297_p0 = scmp.ge.s32.totalorder %s488_s9, 1  ;;  %p107_p2 = scmp.lt.s32.totalorder %s488_s9, 5 }
  0x2e   : > { %p108_p7 = pnand %p297_p0, %p107_p2 }
  0x2f   : > { %s609_s23 = sand.u32 (!%p108_p7), 1, %s480_s7  }
  0x30   : > { %111 = sbr.rel (%p108_p7) target bundleno = 100 (0x64), region = 24  ;;  %s298_s24 = sshll.u32 (!%p108_p7), %s609_s23, 7 }
  0x31   : > { %s114_s26 = scalar_lea.sflag (!%p108_p7), [#allocation3], %s609_s23  ;;  %s615_s30 = scalar_lea.vmem (!%p108_p7), [#allocation2], %s298_s24 }
  0x37   : > { %467 = dma.done.wait (%p549_p6), %s114_s26, 2048  }
  0x38   : > { %469 = vsyncadd (%p549_p6), %s114_s26, 4294965248  ;;  %v138_v0 = vld [vmem:[%s615_s30] sm:$0xff]  ;;  %v139_v1 = vld [vmem:[%s615_s30 + $0x8] sm:$0xff]  ;;  %s639_s17 = scalar_lea.vmem [#allocation5], %s298_s24  ;;  %s309_s25 = sshll.u32 %s527_s10, 11 }
  0x39   : > { %v140_v2 = vld [vmem:[%s615_s30 + $0x10] sm:$0xff]  ;;  %v154_v3 = vmul.f32 1.442695, %v138_v0  ;;  %v156_v4 = vmul.f32 1.442695, %v139_v1  ;;  %v141_v6 = vld [vmem:[%s615_s30 + $0x18] sm:$0xff]  ;;  %s659_s2 = scalar_lea.hbm %s708_s1, %s309_s25 }
  0x3a   : > { %v158_v5 = vmul.f32 1.442695, %v140_v2  ;;  %v142_v7 = vld [vmem:[%s615_s30 + $0x20] sm:$0xff]  ;;  %v143_v8 = vld [vmem:[%s615_s30 + $0x28] sm:$0xff]  ;;  %v160_v9 = vmul.f32 1.442695, %v141_v6 }
  0x3b   : > { %360 = vpow2.f32 %v154_v3  ;;  %v162_v10 = vmul.f32 1.442695, %v142_v7  ;;  %v164_v11 = vmul.f32 1.442695, %v143_v8  ;;  %v144_v12 = vld [vmem:[%s615_s30 + $0x30] sm:$0xff]  ;;  %v145_v13 = vld [vmem:[%s615_s30 + $0x38] sm:$0xff] }
  0x3c   : > { %362 = vpow2.f32 %v156_v4  ;;  %v146_v14 = vld [vmem:[%s615_s30 + $0x40] sm:$0xff]  ;;  %v166_v15 = vmul.f32 1.442695, %v144_v12  ;;  %v168_v16 = vmul.f32 1.442695, %v145_v13  ;;  %v147_v17 = vld [vmem:[%s615_s30 + $0x48] sm:$0xff] }
  0x3d   : > { %364 = vpow2.f32 %v158_v5  ;;  %v148_v18 = vld [vmem:[%s615_s30 + $0x50] sm:$0xff]  ;;  %v170_v19 = vmul.f32 1.442695, %v146_v14  ;;  %v149_v20 = vld [vmem:[%s615_s30 + $0x58] sm:$0xff]  ;;  %v172_v21 = vmul.f32 1.442695, %v147_v17 }
  0x3e   : > { %366 = vpow2.f32 %v160_v9  ;;  %v150_v22 = vld [vmem:[%s615_s30 + $0x60] sm:$0xff]  ;;  %v174_v23 = vmul.f32 1.442695, %v148_v18  ;;  %v151_v24 = vld [vmem:[%s615_s30 + $0x68] sm:$0xff]  ;;  %v176_v25 = vmul.f32 1.442695, %v149_v20 }
  0x3f   : > { %368 = vpow2.f32 %v162_v10  ;;  %v152_v26 = vld [vmem:[%s615_s30 + $0x70] sm:$0xff]  ;;  %v178_v27 = vmul.f32 1.442695, %v150_v22  ;;  %v153_v28 = vld [vmem:[%s615_s30 + $0x78] sm:$0xff]  ;;  %v180_v29 = vmul.f32 1.442695, %v151_v24 }
  0x40   : > { %370 = vpow2.f32 %v164_v11  ;;  %v182_v31 = vmul.f32 1.442695, %v152_v26  ;;  %v184_v33 = vmul.f32 1.442695, %v153_v28  ;;  %s217_s27 = sshll.u32 %s639_s17, 4  ;;  %s203_s10 = scalar_lea.sflag [#allocation4], %s609_s23  ;;  %s661_s27 = int_to_ptr.vmem [resolvable:$true] %s217_s27 }
  0x41   : > { %372 = vpow2.f32 %v166_v15  ;;  %s422_s3 = scalar_lea.vmem %s661_s27, 2048  ;;  %p715_p10 = scmp.ne.s32.totalorder %s712_s18, 0 }
  0x42   : > { %374 = vpow2.f32 %v168_v16  ;;  %p423_p6 = scmp.ne.s32.totalorder %s661_s27, %s422_s3  ;;  %s493_s4 = smov [#allocation5]  }
  0x43   : > { %376 = vpow2.f32 %v170_v19  ;;  %s426_s5 = sshll.u32 %s493_s4, 4  ;;  %s427_s5 = int_to_ptr.vmem [resolvable:$false] %s426_s5 }
  0x44   : > { %378 = vpow2.f32 %v172_v21  ;;  %p424_p11 = pnand %p423_p6, %p715_p10  ;;  %s428_s11 = scalar_lea.vmem %s427_s5, 4096 }
  0x45   : > { %v361_v30 = vpop.eup %360  ;;  %380 = vpow2.f32 %v174_v23  ;;  %p429_p8 = scmp.lt.s32.totalorder %s661_s27, %s427_s5  ;;  %p430_p9 = scmp.lt.s32.totalorder %s428_s11, %s422_s3 }
  0x46   : > { %v363_v32 = vpop.eup %362  ;;  %186 = vst [vmem:[%s639_s17] sm:$0xff] %v361_v30  ;;  %382 = vpow2.f32 %v176_v25  ;;  %p425_p12 = pneg %p424_p11 }
  0x47   : > { %v365_v34 = vpop.eup %364  ;;  %187 = vst [vmem:[%s639_s17 + $0x8] sm:$0xff] %v363_v32  ;;  %384 = vpow2.f32 %v178_v27  ;;  %p431_p13 = por %p430_p9, %p429_p8 }
  0x48   : > { %v367_v35 = vpop.eup %366  ;;  %188 = vst [vmem:[%s639_s17 + $0x10] sm:$0xff] %v365_v34  ;;  %386 = vpow2.f32 %v180_v29 }
  0x49   : > { %v369_v36 = vpop.eup %368  ;;  %189 = vst [vmem:[%s639_s17 + $0x18] sm:$0xff] %v367_v35  ;;  %388 = vpow2.f32 %v182_v31  ;;  %p432_p1 = pnand %p431_p13, %p425_p12 }
  0x4a   : > { %v371_v37 = vpop.eup %370  ;;  %190 = vst [vmem:[%s639_s17 + $0x20] sm:$0xff] %v369_v36  ;;  %390 = vpow2.f32 %v184_v33 }
  0x4b   : > { %v373_v38 = vpop.eup %372  ;;  %191 = vst [vmem:[%s639_s17 + $0x28] sm:$0xff] %v371_v37 }
  0x4c   : > { %v375_v39 = vpop.eup %374  ;;  %192 = vst [vmem:[%s639_s17 + $0x30] sm:$0xff] %v373_v38 }
  0x4d   : > { %v377_v40 = vpop.eup %376  ;;  %193 = vst [vmem:[%s639_s17 + $0x38] sm:$0xff] %v375_v39 }
  0x4e   : > { %v379_v41 = vpop.eup %378  ;;  %194 = vst [vmem:[%s639_s17 + $0x40] sm:$0xff] %v377_v40 }
  0x4f   : > { %v381_v42 = vpop.eup %380  ;;  %195 = vst [vmem:[%s639_s17 + $0x48] sm:$0xff] %v379_v41 }
  0x50   : > { %v383_v43 = vpop.eup %382  ;;  %196 = vst [vmem:[%s639_s17 + $0x50] sm:$0xff] %v381_v42 }
  0x51   : > { %v385_v44 = vpop.eup %384  ;;  %197 = vst [vmem:[%s639_s17 + $0x58] sm:$0xff] %v383_v43 }
  0x52   : > { %v387_v45 = vpop.eup %386  ;;  %198 = vst [vmem:[%s639_s17 + $0x60] sm:$0xff] %v385_v44 }
  0x53   : > { %v389_v46 = vpop.eup %388  ;;  %199 = vst [vmem:[%s639_s17 + $0x68] sm:$0xff] %v387_v45 }
  0x54   : > { %v391_v47 = vpop.eup %390  ;;  %200 = vst [vmem:[%s639_s17 + $0x70] sm:$0xff] %v389_v46 }
  0x55   : > { %201 = vst [vmem:[%s639_s17 + $0x78] sm:$0xff] %v391_v47 }
  0x56   : > { %435 = shalt.err (!%p432_p1)
}
  0x57   : > { %s436_s13 = scalar_lea.hbm %s659_s2, 2048  ;;  %s440_s20 = scalar_lea.hbm %s708_s1, 8192 }
  0x58   : > { %p437_p3 = scmp.ne.s32.totalorder %s659_s2, %s436_s13  ;;  %p441_p0 = scmp.lt.u32.totalorder %s659_s2, %s708_s1 }
  0x59   : > { %p442_p2 = scmp.lt.u32.totalorder %s440_s20, %s436_s13  ;;  %p444_p6 = scmp.lt.u32.totalorder %s436_s13, %s659_s2 }
  0x5a   : > { %p438_p4 = pnand %p437_p3, %p715_p10 }
  0x5b   : > { %p443_p7 = por %p442_p2, %p441_p0 }
  0x5c   : > { %p439_p5 = pneg %p438_p4 }
  0x5d   : > { %p445_p11 = por %p444_p6, %p443_p7 }
  0x5f   : > { %p446_p12 = pnand %p445_p11, %p439_p5 }
  0x61   : > { %449 = shalt.err (!%p446_p12)
}
  0x62   : > { %s494_s24 = smov 1024   ;;  %s495_s26 = smov 64  }
  0x63   : > { %312 = dma.vmem_to_hbm [thread:$0]  (%p715_p10), %s661_s27, 2048, %s659_s2, %s203_s10, %s494_s24, %s494_s24, %s495_s26  }
  0x64 PF: > { %p323_p8 = scmp.ge.s32.totalorder %s488_s9, 2  ;;  %s232_s30 = sand.u32 1, %s476_s6  }
  0x65   : > { %p716_p9 = scmp.ne.s32.totalorder %s713_s19, 0  ;;  %s233_s17 = scalar_lea.sflag [#allocation4], %s232_s30 }
  0x67   : > { %p319_p13 = pnand %p323_p8, %p716_p9 }
  0x69   : > { %471 = dma.done.wait (!%p319_p13), %s233_s17, 2048  }
  0x6a   : > { %473 = vsyncadd (!%p319_p13), %s233_s17, 4294965248  ;;  %p14_p1 = scmp.ge.s32.totalorder %s531_s12, 6   ;;  %s717_s6 = smov %s480_s7 }
  0x6b   : > { %s718_s7 = smov %s484_s8  ;;  %s719_s8 = smov %s543_s15 }
  0x6c   : > { %s720_s9 = smov %s531_s12  ;;  %16 = sbr.rel (!%p14_p1) target bundleno = 5 (0x5), region = 69 }
  0x73   :  { %238 = vsyncpa [#allocation3], 1 }
  0x74   :  { %240 = vsyncpa [#allocation3 + $0x1], 1 }
  0x75   :  { %241 = vsyncpa [#allocation4], 1 }
  0x76   :  { %243 = vsyncpa [#allocation4 + $0x1], 1 }

</bundles_post_ra>
